<compile_context>
chip_gen: v5e
topology: v5e:2x2
jax: 0.10.0
libtpu: 0.0.40
codegen_flags: <defaults>
</compile_context>

<pallas_src>
import functools
import math

import jax
import jax.numpy as jnp
import numpy as np
from jax import lax
from jax.experimental import pallas as pl
from jax.experimental.pallas import tpu as pltpu


# ---------------------------------------------------------------------------
# Pallas kernel: full HarmonicModel forward for a block of TB batch elements
# ---------------------------------------------------------------------------
def harmonic_kernel(p_ref, wc_ref, bc_ref, u_ref, w1_ref, b1_ref, w2_ref,
                    b2_ref, o_ref, *, tb, l_pad, l_out):
    f = wc_ref.shape[1]

    # --- Conv1d over the whole block as ONE 2-D matmul (f32 MXU accum) ------
    acc = jnp.dot(p_ref[...], wc_ref[...],
                  preferred_element_type=jnp.float32)          # (TB*Lp, F)
    conved = jnp.tanh(acc + bc_ref[...])                       # (TB*Lp, F) f32
    conved3 = conved.reshape(tb, l_pad, f)                     # tile-aligned split

    # --- attention logits in the native (time=sublane, F=lane) layout -------
    # VPU multiply + XLU lane reduce; no degenerate M=1 matmuls on the MXU.
    logits = jnp.sum(conved3 * u_ref[...], axis=-1,
                     keepdims=True)                            # (TB, Lp, 1)
    if l_pad != l_out:  # mask padded time rows out of the softmax
        t_idx = lax.broadcasted_iota(jnp.int32, (1, l_pad, 1), 1)
        logits = jnp.where(t_idx < l_out, logits, jnp.float32(-1e30))

    # --- softmax over time (sublane reductions); exact divide (1 scalar/row)-
    m = jnp.max(logits, axis=1, keepdims=True)                 # (TB, 1, 1)
    e = jnp.exp(logits - m)                                    # pads -> 0
    attn = e / jnp.sum(e, axis=1, keepdims=True)               # (TB, Lp, 1)

    # --- attention pooling: weighted sum over time (VPU + sublane reduce) ---
    v2 = jnp.sum(conved3 * attn, axis=1)                       # (TB, F)

    # --- fc1 + relu, batched over TB -----------------------------------------
    h = jnp.maximum(
        jnp.dot(v2, w1_ref[...], preferred_element_type=jnp.float32)
        + b1_ref[...], 0.0)                                    # (TB, H)
    # TODO(synk): nn.Dropout omitted (identity at inference time).

    # --- fc2, lane-padded to 128 so the store is unmasked --------------------
    y = jnp.dot(h, w2_ref[...], preferred_element_type=jnp.float32) + b2_ref[...]
    o_ref[...] = y.astype(o_ref.dtype)                         # (TB, NLp)


# ---------------------------------------------------------------------------
# Wrapper: layout prep (im2col, flattening, padding) + pallas_call
# ---------------------------------------------------------------------------
def harmonic_forward(x, params, *, kernel_size, block_b=None, use_bf16=False):
    """x: (B, L, n_harmonics+1) float32. Returns (B, n_labels) float32."""
    wc, bc, u, w1, b1, w2, b2 = params
    B, L, C_in = x.shape
    F = wc.shape[0]
    H = w1.shape[0]
    NL = w2.shape[0]
    K = kernel_size
    pad = K // 2
    L_out = L + 2 * pad - K + 1
    KC = K * C_in
    Lp = ((L_out + 7) // 8) * 8          # time padded -> (batch,time) merge is
                                         # (8,128)-tile aligned
    NLp = ((NL + 127) // 128) * 128      # lane-dense output stores
    itemsize = 2 if use_bf16 else 4

    # --- batch block: VMEM-budgeted, multiple of 8 ---------------------------
    if block_b is None:
        per_b = Lp * KC * itemsize                      # patch bytes / element
        budget = 16 * 1024 * 1024                       # 2x-buffered patches,
        cap = min(512, max(8, (budget // (2 * per_b)) // 8 * 8))  # v7x-safe
        # prefer >=2 grid steps once the batch allows it (v7x has 2 TCs);
        # v5e/v6e (1 TC, 128 MiB VMEM) just take the larger cap.
        half = max(8, (((B + 1) // 2) + 7) // 8 * 8)
        block_b = min(cap, half)
    block_b = max(8, (block_b + 7) // 8 * 8)
    n_blocks = pl.cdiv(B, block_b)
    Bp = n_blocks * block_b

    # --- im2col patches (glue in plain JAX), lane dim = K*C_in ---------------
    x_pad = jnp.pad(x, ((0, 0), (pad, pad), (0, 0)))            # (B, L+2p, C_in)
    patches = jnp.concatenate(
        [x_pad[:, k:k + L_out, :] for k in range(K)], axis=-1)  # (B, L_out, KC)
    patches = jnp.pad(patches, ((0, Bp - B), (0, Lp - L_out), (0, 0)))
    patches2d = patches.reshape(Bp * Lp, KC)                    # one MXU slab
    # TODO(synk): for very long L, build patches inside the kernel from the raw
    # x block (K shifted matmuls) to avoid the K-fold HBM blowup (helps v5e BW).

    # W2[k*C_in + c, f] = wc[f, c, k]  (matches the patch ordering above)
    wc2 = jnp.transpose(wc, (2, 1, 0)).reshape(KC, F)
    if use_bf16:   # bf16 MXU inputs (halve streamed bytes), f32 accumulation
        patches2d = patches2d.astype(jnp.bfloat16)
        wc2 = wc2.astype(jnp.bfloat16)

    bc2 = bc.reshape(1, F)
    u2 = u.reshape(1, F)
    w1_t = w1.T                                                 # (F, H)
    b1_2 = b1.reshape(1, H)
    w2_t = jnp.pad(w2.T, ((0, 0), (0, NLp - NL)))               # (H, NLp)
    b2_2 = jnp.pad(b2.reshape(1, NL), ((0, 0), (0, NLp - NL)))  # (1, NLp)

    flops = (2 * Bp * Lp * KC * F            # conv matmul
             + 4 * Bp * Lp * F               # attention logits + pooling
             + 2 * Bp * (F * H + H * NLp))   # fc1 + fc2
    bytes_accessed = (Bp * Lp * KC * itemsize + KC * F * itemsize
                      + (2 * F + F * H + H + H * NLp + NLp) * 4
                      + Bp * NLp * 4)
    cost = pl.CostEstimate(flops=flops, transcendentals=Bp * Lp * (F + 1),
                           bytes_accessed=bytes_accessed)

    kernel = functools.partial(harmonic_kernel, tb=block_b, l_pad=Lp,
                               l_out=L_out)

    out_full = pl.pallas_call(
        kernel,
        out_shape=jax.ShapeDtypeStruct((Bp, NLp), jnp.float32),
        grid_spec=pltpu.PrefetchScalarGridSpec(
            num_scalar_prefetch=0,
            grid=(n_blocks,),
            in_specs=[
                # only streamed operand; all weight blocks resolve to (0,0)
                # each step and stay resident in VMEM.
                # (bump to pipeline_mode=pl.Buffered(3) if xprof shows exposed
                #  patch DMA on v5e.)
                pl.BlockSpec((block_b * Lp, KC), lambda b: (b, 0)),
                pl.BlockSpec((KC, F), lambda b: (0, 0)),
                pl.BlockSpec((1, F), lambda b: (0, 0)),
                pl.BlockSpec((1, F), lambda b: (0, 0)),
                pl.BlockSpec((F, H), lambda b: (0, 0)),
                pl.BlockSpec((1, H), lambda b: (0, 0)),
                pl.BlockSpec((H, NLp), lambda b: (0, 0)),
                pl.BlockSpec((1, NLp), lambda b: (0, 0)),
            ],
            out_specs=pl.BlockSpec((block_b, NLp), lambda b: (b, 0)),
        ),
        compiler_params=pltpu.CompilerParams(
            dimension_semantics=("parallel",),
            vmem_limit_bytes=40 * 1024 * 1024),   # explicit: v5e default is 16 MiB
        cost_estimate=cost,
    )(patches2d, wc2, bc2, u2, w1_t, b1_2, w2_t, b2_2)

    # PyTorch's .squeeze() would also drop the batch dim when B == 1; we keep
    # the shape (B, n_labels) and strip batch/label padding here.
    return out_full[:B, :NL]


# ---------------------------------------------------------------------------
# Deterministic parameter init (xavier_uniform for weights, like the module)
# ---------------------------------------------------------------------------
def xavier_uniform(key, shape, fan_in, fan_out):
    bound = math.sqrt(6.0 / (fan_in + fan_out))
    return jax.random.uniform(key, shape, jnp.float32, -bound, bound)


def init_params(key, n_labels, n_harmonics, kernel_size, num_filter_maps, hidden):
    C_in = n_harmonics + 1
    F = num_filter_maps
    ks = jax.random.split(key, 7)
    wc = xavier_uniform(ks[0], (F, C_in, kernel_size),
                        C_in * kernel_size, F * kernel_size)
    bc = jax.random.uniform(ks[1], (F,), jnp.float32, -0.1, 0.1)
    u = xavier_uniform(ks[2], (1, F), F, 1)
    w1 = xavier_uniform(ks[3], (hidden, F), F, hidden)
    b1 = jax.random.uniform(ks[4], (hidden,), jnp.float32, -0.1, 0.1)
    w2 = xavier_uniform(ks[5], (n_labels, hidden), hidden, n_labels)
    b2 = jax.random.uniform(ks[6], (n_labels,), jnp.float32, -0.1, 0.1)
    return wc, bc, u, w1, b1, w2, b2


# ---------------------------------------------------------------------------
# Pure-JAX reference (mirrors the PyTorch forward) for a correctness check
# ---------------------------------------------------------------------------
def reference_forward(x, params, *, kernel_size):
    wc, bc, u, w1, b1, w2, b2 = params
    K = kernel_size
    pad = K // 2
    xt = jnp.transpose(x, (0, 2, 1))                     # (B, C_in, L)
    xp = jnp.pad(xt, ((0, 0), (0, 0), (pad, pad)))
    L_out = x.shape[1] + 2 * pad - K + 1
    hp = 'highest'
    cols = [jnp.einsum('bck,fck->bf', xp[:, :, t:t + K], wc, precision=hp) + bc
            for t in range(L_out)]
    conved = jnp.tanh(jnp.stack(cols, axis=-1))          # (B, F, L_out)
    logits = jnp.einsum('of,bfl->bol', u, conved, precision=hp)
    attn = jax.nn.softmax(logits, axis=2)
    v = jnp.einsum('bol,blf->bof', attn,
                   jnp.transpose(conved, (0, 2, 1)), precision=hp)
    h = jax.nn.relu(jnp.einsum('bof,hf->boh', v, w1, precision=hp) + b1)
    y = jnp.einsum('boh,nh->bon', h, w2, precision=hp) + b2
    return jnp.squeeze(y)


if __name__ == "__main__":
    # small shapes consistent with the module
    B, L = 8, 16
    n_harmonics = 3            # C_in = 4
    n_labels = 8
    kernel_size = 10
    num_filter_maps = 16
    hidden = 64

    key = jax.random.PRNGKey(0)
    k_x, k_p = jax.random.split(key)
    x = jax.random.normal(k_x, (B, L, n_harmonics + 1), jnp.float32)
    params = init_params(k_p, n_labels, n_harmonics, kernel_size,
                         num_filter_maps, hidden)

    out = harmonic_forward(x, params, kernel_size=kernel_size)
    out = jax.block_until_ready(out)

    ref = reference_forward(x, params, kernel_size=kernel_size)
    np.testing.assert_allclose(np.asarray(out), np.asarray(ref),
                               rtol=1e-4, atol=1e-4)
    print("KERNEL_OK")
</pallas_src>

<mosaic_0001>
module attributes {stable_mosaic.version = 11 : i64} {
  func.func @harmonic_kernel(%arg0: i32, %arg1: memref<192x40xf32, #tpu.memory_space<vmem>>, %arg2: memref<40x16xf32, #tpu.memory_space<vmem>>, %arg3: memref<1x16xf32, #tpu.memory_space<vmem>>, %arg4: memref<1x16xf32, #tpu.memory_space<vmem>>, %arg5: memref<16x64xf32, #tpu.memory_space<vmem>>, %arg6: memref<1x64xf32, #tpu.memory_space<vmem>>, %arg7: memref<64x128xf32, #tpu.memory_space<vmem>>, %arg8: memref<1x128xf32, #tpu.memory_space<vmem>>, %arg9: memref<8x128xf32, #tpu.memory_space<vmem>>) attributes {dimension_semantics = [#tpu.dimension_semantics<parallel>], iteration_bounds = array<i64: 1>, scalar_prefetch = 0 : i64, scratch_operands = 0 : i64, tpu.core_type = #tpu.core_type<tc>, window_params = [{transform_indices = @transform_0, window_bounds = array<i64: 192, 40>}, {pipeline_mode = #tpu.pipeline_mode<synchronous>, transform_indices = @transform_1, window_bounds = array<i64: 40, 16>}, {pipeline_mode = #tpu.pipeline_mode<synchronous>, transform_indices = @transform_2, window_bounds = array<i64: 1, 16>}, {pipeline_mode = #tpu.pipeline_mode<synchronous>, transform_indices = @transform_3, window_bounds = array<i64: 1, 16>}, {pipeline_mode = #tpu.pipeline_mode<synchronous>, transform_indices = @transform_4, window_bounds = array<i64: 16, 64>}, {pipeline_mode = #tpu.pipeline_mode<synchronous>, transform_indices = @transform_5, window_bounds = array<i64: 1, 64>}, {pipeline_mode = #tpu.pipeline_mode<synchronous>, transform_indices = @transform_6, window_bounds = array<i64: 64, 128>}, {pipeline_mode = #tpu.pipeline_mode<synchronous>, transform_indices = @transform_7, window_bounds = array<i64: 1, 128>}, {transform_indices = @transform_8, window_bounds = array<i64: 8, 128>}]} {
    %c0 = arith.constant 0 : index
    %c0_0 = arith.constant 0 : index
    %0 = vector.load %arg1[%c0, %c0_0] : memref<192x40xf32, #tpu.memory_space<vmem>>, vector<192x40xf32>
    %c0_1 = arith.constant 0 : index
    %c0_2 = arith.constant 0 : index
    %1 = vector.load %arg2[%c0_1, %c0_2] : memref<40x16xf32, #tpu.memory_space<vmem>>, vector<40x16xf32>
    %cst = arith.constant dense<0.000000e+00> : vector<192x16xf32>
    %2 = tpu.matmul %0, %1, %cst {dimension_numbers = #tpu.dot_dimension_numbers<[1], [0], [0], [1], [0, 0, 1, 1], [], []>} : vector<192x40xf32>, vector<40x16xf32>, vector<192x16xf32> -> vector<192x16xf32>
    %c0_3 = arith.constant 0 : index
    %c0_4 = arith.constant 0 : index
    %3 = vector.load %arg3[%c0_3, %c0_4] : memref<1x16xf32, #tpu.memory_space<vmem>>, vector<1x16xf32>
    %4 = vector.broadcast %3 : vector<1x16xf32> to vector<192x16xf32>
    %5 = arith.addf %2, %4 : vector<192x16xf32>
    %6 = math.tanh %5 : vector<192x16xf32>
    %7 = vector.shape_cast %6 : vector<192x16xf32> to vector<8x24x16xf32>
    %c0_5 = arith.constant 0 : index
    %c0_6 = arith.constant 0 : index
    %8 = vector.load %arg4[%c0_5, %c0_6] : memref<1x16xf32, #tpu.memory_space<vmem>>, vector<1x16xf32>
    %9 = vector.shape_cast %8 : vector<1x16xf32> to vector<1x1x16xf32>
    %10 = vector.broadcast %9 : vector<1x1x16xf32> to vector<8x24x16xf32>
    %11 = arith.mulf %7, %10 : vector<8x24x16xf32>
    %cst_7 = arith.constant dense<0.000000e+00> : vector<8x24xf32>
    %12 = vector.multi_reduction <add>, %11, %cst_7 [2] : vector<8x24x16xf32> to vector<8x24xf32>
    %13 = vector.shape_cast %12 : vector<8x24xf32> to vector<8x24x1xf32>
    %14 = tpu.iota {dimensions = array<i32: 1>} : vector<1x24x1xi32>
    %c17_i32 = arith.constant 17 : i32
    %15 = vector.broadcast %c17_i32 : i32 to vector<1x24x1xi32>
    %16 = arith.cmpi slt, %14, %15 : vector<1x24x1xi32>
    %cst_8 = arith.constant -1.000000e+30 : f32
    %17 = vector.shape_cast %16 : vector<1x24x1xi1> to vector<1x24x1xi1>
    %18 = vector.broadcast %17 : vector<1x24x1xi1> to vector<8x24x1xi1>
    %19 = vector.broadcast %cst_8 : f32 to vector<8x24x1xf32>
    %20 = arith.select %18, %13, %19 : vector<8x24x1xi1>, vector<8x24x1xf32>
    %cst_9 = arith.constant dense<0xFF800000> : vector<8x1xf32>
    %21 = vector.multi_reduction <maximumf>, %20, %cst_9 [1] : vector<8x24x1xf32> to vector<8x1xf32>
    %22 = vector.shape_cast %21 : vector<8x1xf32> to vector<8x1x1xf32>
    %23 = vector.broadcast %22 : vector<8x1x1xf32> to vector<8x24x1xf32>
    %24 = arith.subf %20, %23 : vector<8x24x1xf32>
    %25 = math.exp %24 : vector<8x24x1xf32>
    %cst_10 = arith.constant dense<0.000000e+00> : vector<8x1xf32>
    %26 = vector.multi_reduction <add>, %25, %cst_10 [1] : vector<8x24x1xf32> to vector<8x1xf32>
    %27 = vector.shape_cast %26 : vector<8x1xf32> to vector<8x1x1xf32>
    %28 = vector.broadcast %27 : vector<8x1x1xf32> to vector<8x24x1xf32>
    %29 = arith.divf %25, %28 : vector<8x24x1xf32>
    %30 = vector.broadcast %29 : vector<8x24x1xf32> to vector<8x24x16xf32>
    %31 = arith.mulf %7, %30 : vector<8x24x16xf32>
    %cst_11 = arith.constant dense<0.000000e+00> : vector<8x16xf32>
    %32 = vector.multi_reduction <add>, %31, %cst_11 [1] : vector<8x24x16xf32> to vector<8x16xf32>
    %c0_12 = arith.constant 0 : index
    %c0_13 = arith.constant 0 : index
    %33 = vector.load %arg5[%c0_12, %c0_13] : memref<16x64xf32, #tpu.memory_space<vmem>>, vector<16x64xf32>
    %cst_14 = arith.constant dense<0.000000e+00> : vector<8x64xf32>
    %34 = tpu.matmul %32, %33, %cst_14 {dimension_numbers = #tpu.dot_dimension_numbers<[1], [0], [0], [1], [0, 0, 1, 1], [], []>} : vector<8x16xf32>, vector<16x64xf32>, vector<8x64xf32> -> vector<8x64xf32>
    %c0_15 = arith.constant 0 : index
    %c0_16 = arith.constant 0 : index
    %35 = vector.load %arg6[%c0_15, %c0_16] : memref<1x64xf32, #tpu.memory_space<vmem>>, vector<1x64xf32>
    %36 = vector.broadcast %35 : vector<1x64xf32> to vector<8x64xf32>
    %37 = arith.addf %34, %36 : vector<8x64xf32>
    %cst_17 = arith.constant 0.000000e+00 : f32
    %38 = vector.broadcast %cst_17 : f32 to vector<8x64xf32>
    %39 = arith.maximumf %37, %38 : vector<8x64xf32>
    %c0_18 = arith.constant 0 : index
    %c0_19 = arith.constant 0 : index
    %40 = vector.load %arg7[%c0_18, %c0_19] : memref<64x128xf32, #tpu.memory_space<vmem>>, vector<64x128xf32>
    %cst_20 = arith.constant dense<0.000000e+00> : vector<8x128xf32>
    %41 = tpu.matmul %39, %40, %cst_20 {dimension_numbers = #tpu.dot_dimension_numbers<[1], [0], [0], [1], [0, 0, 1, 1], [], []>} : vector<8x64xf32>, vector<64x128xf32>, vector<8x128xf32> -> vector<8x128xf32>
    %c0_21 = arith.constant 0 : index
    %c0_22 = arith.constant 0 : index
    %42 = vector.load %arg8[%c0_21, %c0_22] : memref<1x128xf32, #tpu.memory_space<vmem>>, vector<1x128xf32>
    %43 = vector.broadcast %42 : vector<1x128xf32> to vector<8x128xf32>
    %44 = arith.addf %41, %43 : vector<8x128xf32>
    %c0_23 = arith.constant 0 : index
    %c0_24 = arith.constant 0 : index
    %45 = vector.load %arg9[%c0_23, %c0_24] : memref<8x128xf32, #tpu.memory_space<vmem>>, vector<8x128xf32>
    tpu.vector_store %arg9[%c0_23, %c0_24], %44 {strides = array<i32>} : memref<8x128xf32, #tpu.memory_space<vmem>>, vector<8x128xf32>,
    return
  }
  func.func @transform_0(%arg0: i32) -> (i32, i32) {
    %c0_i32 = arith.constant 0 : i32
    %c0_i32_0 = arith.constant 0 : i32
    return %arg0, %c0_i32 : i32, i32
  }
  func.func @transform_1(%arg0: i32) -> (i32, i32) {
    %c0_i32 = arith.constant 0 : i32
    %c0_i32_0 = arith.constant 0 : i32
    %c0_i32_1 = arith.constant 0 : i32
    return %c0_i32, %c0_i32_0 : i32, i32
  }
  func.func @transform_2(%arg0: i32) -> (i32, i32) {
    %c0_i32 = arith.constant 0 : i32
    %c0_i32_0 = arith.constant 0 : i32
    %c0_i32_1 = arith.constant 0 : i32
    return %c0_i32, %c0_i32_0 : i32, i32
  }
  func.func @transform_3(%arg0: i32) -> (i32, i32) {
    %c0_i32 = arith.constant 0 : i32
    %c0_i32_0 = arith.constant 0 : i32
    %c0_i32_1 = arith.constant 0 : i32
    return %c0_i32, %c0_i32_0 : i32, i32
  }
  func.func @transform_4(%arg0: i32) -> (i32, i32) {
    %c0_i32 = arith.constant 0 : i32
    %c0_i32_0 = arith.constant 0 : i32
    %c0_i32_1 = arith.constant 0 : i32
    return %c0_i32, %c0_i32_0 : i32, i32
  }
  func.func @transform_5(%arg0: i32) -> (i32, i32) {
    %c0_i32 = arith.constant 0 : i32
    %c0_i32_0 = arith.constant 0 : i32
    %c0_i32_1 = arith.constant 0 : i32
    return %c0_i32, %c0_i32_0 : i32, i32
  }
  func.func @transform_6(%arg0: i32) -> (i32, i32) {
    %c0_i32 = arith.constant 0 : i32
    %c0_i32_0 = arith.constant 0 : i32
    %c0_i32_1 = arith.constant 0 : i32
    return %c0_i32, %c0_i32_0 : i32, i32
  }
  func.func @transform_7(%arg0: i32) -> (i32, i32) {
    %c0_i32 = arith.constant 0 : i32
    %c0_i32_0 = arith.constant 0 : i32
    %c0_i32_1 = arith.constant 0 : i32
    return %c0_i32, %c0_i32_0 : i32, i32
  }
  func.func @transform_8(%arg0: i32) -> (i32, i32) {
    %c0_i32 = arith.constant 0 : i32
    %c0_i32_0 = arith.constant 0 : i32
    return %arg0, %c0_i32 : i32, i32
  }
}

</mosaic_0001>

<bundles_post_ra>
// kernel: tpu_custom_call.1
= control target key start
LH: loop header
LB: loop body
LE: loop exit
PB: predicated region body
PF: predicated region fallthrough
CT: control target
= control target key end

     0   :  { %vm63_vm0 = vcmask 326656   ;;  %s1879_s0 = inlined_call_operand.vmem [shape: f32[192,40], index: 0, kind: input, shape index: {}]   ;;  %s1880_s1 = inlined_call_operand.vmem [shape: f32[40,16], index: 1, kind: input, shape index: {}]   ;;  %s1881_s2 = inlined_call_operand.vmem [shape: f32[1,16], index: 2, kind: input, shape index: {}]   ;;  %s1882_s3 = inlined_call_operand.vmem [shape: f32[1,16], index: 3, kind: input, shape index: {}]   ;;  %s1883_s4 = inlined_call_operand.vmem [shape: f32[16,64], index: 4, kind: input, shape index: {}]   ;;  %s1884_s5 = inlined_call_operand.vmem [shape: f32[1,64], index: 5, kind: input, shape index: {}]   ;;  %s1885_s6 = inlined_call_operand.vmem [shape: f32[64,128], index: 6, kind: input, shape index: {}]   ;;  %s1886_s7 = inlined_call_operand.vmem [shape: f32[1,128], index: 7, kind: input, shape index: {}]   ;;  %s1887_s8 = inlined_call_operand.hbm [shape: f32[8,128], index: 8, kind: output, shape index: {}]  }
   0x1   :  { %v58_v0 = vld [vmem:[%s1880_s1 + $0x20] sm:$0xff]  ;;  %v57_v1 = vld [vmem:[%s1880_s1 + $0x18] sm:$0xff]  ;;  %v56_v2 = vld [vmem:[%s1880_s1 + $0x10] sm:$0xff] }
   0x2   :  { %147 = vmatpush.msra.mxu0 %v58_v0  ;;  %965 = vmatpush.msra.mxu1 %v58_v0  ;;  %v55_v3 = vld [vmem:[%s1880_s1 + $0x8] sm:$0xff]  ;;  %v54_v4 = vld [vmem:[%s1880_s1] sm:$0xff]  ;;  %v37_v6 = vld [vmem:[%s1879_s0 + $0x38] sm:$0xff] }
   0x3   :  { %967 = vmatpush.msra.mxu3 %v58_v0  ;;  %966 = vmatpush.msra.mxu2 %v58_v0  ;;  %v30_v5 = vld [vmem:[%s1879_s0] sm:$0xff]  ;;  %v47_v7 = vld [vmem:[%s1879_s0 + $0x88] sm:$0xff] }
   0x4   :  { %148 = vmatpush.msra.mxu0 %v57_v1  ;;  %968 = vmatpush.msra.mxu1 %v57_v1 }
   0x5   :  { %970 = vmatpush.msra.mxu3 %v57_v1  ;;  %969 = vmatpush.msra.mxu2 %v57_v1 }
   0x6   :  { %149 = vmatpush.msra.mxu0 %v56_v2  ;;  %971 = vmatpush.msra.mxu1 %v56_v2 }
   0x7   :  { %973 = vmatpush.msra.mxu3 %v56_v2  ;;  %972 = vmatpush.msra.mxu2 %v56_v2 }
   0x8   :  { %150 = vmatpush.msra.mxu0 %v55_v3  ;;  %974 = vmatpush.msra.mxu1 %v55_v3 }
   0x9   :  { %976 = vmatpush.msra.mxu3 %v55_v3  ;;  %975 = vmatpush.msra.mxu2 %v55_v3 }
   0xa   :  { %13 = vsyncpa [#allocation3], 0  ;;  %151 = vmatpush.msra.mxu0 %v54_v4  ;;  %977 = vmatpush.msra.mxu1 %v54_v4  ;;  %v43_v8 = vld [vmem:[%s1879_s0 + $0x68] sm:$0xff]  ;;  %v38_v10 = vld [vmem:[%s1879_s0 + $0x40] sm:$0xff]  ;;  %vm277_vm1 = vcmask 130048   ;;  %s1123_s18 = smov [#allocation2]  }
   0xb   :  { %979 = vmatpush.msra.mxu3 %v54_v4  ;;  %939 = vmatmul.msk.f32.vlgmr.msra.gmra.mxu0 %vm63_vm0, %v30_v5  ;;  %v31_v9 = vld [vmem:[%s1879_s0 + $0x8] sm:$0xff]  ;;  %v48_v11 = vld [vmem:[%s1879_s0 + $0x90] sm:$0xff]  ;;  %v49_v15 = vld [vmem:[%s1879_s0 + $0x98] sm:$0xff]  ;;  %s928_s19 = sshll.u32 %s1123_s18, 4  ;;  %s929_s19 = int_to_ptr.vmem [resolvable:$true] %s928_s19 }
   0xc   :  { %946 = vmatmul.msk.f32.vlgmr.msra.gmra.mxu1 %vm63_vm0, %v37_v6  ;;  %956 = vmatmul.msk.f32.vlgmr.msra.gmra.mxu3 %vm63_vm0, %v47_v7  ;;  %v44_v12 = vld [vmem:[%s1879_s0 + $0x70] sm:$0xff]  ;;  %v39_v14 = vld [vmem:[%s1879_s0 + $0x48] sm:$0xff]  ;;  %v45_v16 = vld [vmem:[%s1879_s0 + $0x78] sm:$0xff] }
   0xd   :  { %978 = vmatpush.msra.mxu2 %v54_v4  ;;  %v32_v13 = vld [vmem:[%s1879_s0 + $0x10] sm:$0xff]  ;;  %v33_v17 = vld [vmem:[%s1879_s0 + $0x18] sm:$0xff]  ;;  %v50_v19 = vld [vmem:[%s1879_s0 + $0xa0] sm:$0xff] }
   0xe   :  { %952 = vmatmul.msk.f32.vlgmr.msra.gmra.mxu2 %vm63_vm0, %v43_v8  ;;  %v40_v18 = vld [vmem:[%s1879_s0 + $0x50] sm:$0xff]  ;;  %v46_v20 = vld [vmem:[%s1879_s0 + $0x80] sm:$0xff]  ;;  %v41_v22 = vld [vmem:[%s1879_s0 + $0x58] sm:$0xff] }
   0xf   :  { %v34_v21 = vld [vmem:[%s1879_s0 + $0x20] sm:$0xff]  ;;  %v51_v23 = vld [vmem:[%s1879_s0 + $0xa8] sm:$0xff]  ;;  %v52_v26 = vld [vmem:[%s1879_s0 + $0xb0] sm:$0xff] }
  0x10   :  { %v35_v24 = vld [vmem:[%s1879_s0 + $0x28] sm:$0xff]  ;;  %v42_v25 = vld [vmem:[%s1879_s0 + $0x60] sm:$0xff]  ;;  %v36_v27 = vld [vmem:[%s1879_s0 + $0x30] sm:$0xff] }
  0x11   :  { %v53_v28 = vld [vmem:[%s1879_s0 + $0xb8] sm:$0xff]  ;;  %v1283_v29 = vld [vmem:[%s1881_s2] ss:$0 sm:$0xff] }
  0x12   :  { %v1290_v34 = vld [vmem:[%s1882_s3] ss:$0 sm:$0xff] }
  0x13   :  { %940 = vmatmul.msk.f32.gmra.mxu0 %vm63_vm0, %v31_v9 }
  0x14   :  { %947 = vmatmul.msk.f32.gmra.mxu1 %vm63_vm0, %v38_v10  ;;  %957 = vmatmul.msk.f32.gmra.mxu3 %vm63_vm0, %v48_v11 }
  0x16   :  { %953 = vmatmul.msk.f32.gmra.mxu2 %vm63_vm0, %v44_v12 }
  0x1b   :  { %941 = vmatmul.msk.f32.gmra.mxu0 %vm63_vm0, %v32_v13 }
  0x1c   :  { %948 = vmatmul.msk.f32.gmra.mxu1 %vm63_vm0, %v39_v14  ;;  %958 = vmatmul.msk.f32.gmra.mxu3 %vm63_vm0, %v49_v15 }
  0x1e   :  { %954 = vmatmul.msk.f32.gmra.mxu2 %vm63_vm0, %v45_v16 }
  0x23   :  { %942 = vmatmul.msk.f32.gmra.mxu0 %vm63_vm0, %v33_v17 }
  0x24   :  { %949 = vmatmul.msk.f32.gmra.mxu1 %vm63_vm0, %v40_v18  ;;  %959 = vmatmul.msk.f32.gmra.mxu3 %vm63_vm0, %v50_v19 }
  0x26   :  { %955 = vmatmul.msk.f32.gmra.mxu2 %vm63_vm0, %v46_v20 }
  0x2b   :  { %943 = vmatmul.msk.f32.gmra.mxu0 %vm63_vm0, %v34_v21 }
  0x2c   :  { %950 = vmatmul.msk.f32.gmra.mxu1 %vm63_vm0, %v41_v22  ;;  %960 = vmatmul.msk.f32.gmra.mxu3 %vm63_vm0, %v51_v23 }
  0x33   :  { %944 = vmatmul.msk.f32.gmra.mxu0 %vm63_vm0, %v35_v24 }
  0x34   :  { %951 = vmatmul.msk.f32.gmra.mxu1 %vm63_vm0, %v42_v25  ;;  %961 = vmatmul.msk.f32.gmra.mxu3 %vm63_vm0, %v52_v26 }
  0x3b   :  { %945 = vmatmul.msk.f32.gmra.mxu0 %vm63_vm0, %v36_v27 }
  0x3c   :  { %962 = vmatmul.msk.f32.gmra.mxu3 %vm63_vm0, %v53_v28 }
  0x88   :  { %v153_v30 = vpop.f32.mrf.mxu0 }
  0x89   :  { %v154_v31 = vadd.f32 %v1283_v29, %v153_v30  ;;  %v174_v32 = vpop.f32.mrf.mxu1 }
  0x8a   :  { %v175_v33 = vadd.f32 %v1283_v29, %v174_v32 }
  0x8b   :  { %985 = vtanh.f32 %v154_v31 }
  0x8c   :  { %987 = vtanh.f32 %v175_v33 }
  0x8f   :  { %v204_v35 = vpop.f32.mrf.mxu3 }
  0x90   :  { %v205_v36 = vadd.f32 %v1283_v29, %v204_v35  ;;  %v156_v37 = vpop.f32.mrf.mxu0 }
  0x91   :  { %v1293_v38 = vpop.eup %985  ;;  %v157_v39 = vadd.f32 %v1283_v29, %v156_v37  ;;  %v177_v40 = vpop.f32.mrf.mxu1 }
  0x92   :  { %v192_v41 = vpop.f32.mrf.mxu2  ;;  %v1296_v42 = vpop.eup %987  ;;  %989 = vtanh.f32 %v205_v36  ;;  %v178_v43 = vadd.f32 %v1283_v29, %v177_v40  ;;  %v253_v44 = vmul.f32 %v1293_v38, %v1290_v34 }
  0x93   :  { %v193_v45 = vadd.f32 %v1283_v29, %v192_v41  ;;  %991 = vtanh.f32 %v157_v39  ;;  %v260_v46 = vmul.f32 %v1296_v42, %v1290_v34 }
  0x94   :  { %993 = vtanh.f32 %v178_v43  ;;  %v278_v47 = vsel %vm277_vm1, %v253_v44, 0.0 }
  0x95   :  { %279 = vadd.xlane.f32.xlu0 %v278_v47  ;;  %995 = vtanh.f32 %v193_v45  ;;  %v299_v48 = vsel %vm277_vm1, %v260_v46, 0.0 }
  0x96   :  { %300 = vadd.xlane.f32.xlu1 %v299_v48 }
  0x97   :  { %v207_v49 = vpop.f32.mrf.mxu3 }
  0x98   :  { %v1306_v50 = vpop.eup %989  ;;  %v208_v51 = vadd.f32 %v1283_v29, %v207_v49  ;;  %v159_v52 = vpop.f32.mrf.mxu0 }
  0x99   :  { %1901 = vst [vmem:[#allocation5_spill] sm:$0xff] %v1306_v50  ;;  %v1309_v53 = vpop.eup %991  ;;  %v180_v54 = vpop.f32.mrf.mxu1  ;;  %v270_v55 = vmul.f32 %v1306_v50, %v1290_v34  ;;  %v160_v12 = vadd.f32 %v1283_v29, %v159_v52 }
  0x9a   :  { %v195_v56 = vpop.f32.mrf.mxu2  ;;  %v1313_v57 = vpop.eup %993  ;;  %997 = vtanh.f32 %v208_v51  ;;  %v254_v58 = vmul.f32 %v1309_v53, %v1290_v34  ;;  %v181_v61 = vadd.f32 %v1283_v29, %v180_v54 }
  0x9b   :  { %v196_v59 = vadd.f32 %v1283_v29, %v195_v56  ;;  %v1318_v60 = vpop.eup %995  ;;  %v329_v62 = vsel %vm277_vm1, %v270_v55, 0.0  ;;  %v261_v1 = vmul.f32 %v1313_v57, %v1290_v34 }
  0x9c   :  { %330 = vadd.xlane.f32.xlu2 %v329_v62  ;;  %v281_v63 = vsel %vm277_vm1, %v254_v58, 0.0  ;;  %v266_v0 = vmul.f32 %v1318_v60, %v1290_v34 }
  0x9d   :  { %282 = vadd.xlane.f32.xlu0 %v281_v63  ;;  %999 = vtanh.f32 %v196_v59  ;;  %v302_v9 = vsel %vm277_vm1, %v261_v1, 0.0 }
  0x9e   :  { %v317_v2 = vsel %vm277_vm1, %v266_v0, 0.0  ;;  %1001 = vtanh.f32 %v181_v61 }
  0x9f   :  { %v210_v3 = vpop.f32.mrf.mxu3  ;;  %318 = vadd.xlane.f32.xlu1 %v317_v2 }
  0xa0   :  { %v1328_v4 = vpop.eup %997  ;;  %v211_v5 = vadd.f32 %v1283_v29, %v210_v3  ;;  %v162_v6 = vpop.f32.mrf.mxu0 }
  0xa1   :  { %v163_v7 = vadd.f32 %v1283_v29, %v162_v6  ;;  %v183_v8 = vpop.f32.mrf.mxu1  ;;  %v271_v10 = vmul.f32 %v1328_v4, %v1290_v34 }
  0xa2   :  { %v198_v11 = vpop.f32.mrf.mxu2  ;;  %1003 = vtanh.f32 %v211_v5  ;;  %v184_v27 = vadd.f32 %v1283_v29, %v183_v8 }
  0xa3   :  { %v199_v13 = vadd.f32 %v1283_v29, %v198_v11  ;;  %v1337_v14 = vpop.eup %999  ;;  %1005 = vtanh.f32 %v163_v7  ;;  %v332_v15 = vsel %vm277_vm1, %v271_v10, 0.0 }
  0xa4   :  { %1902 = vst [vmem:[#allocation6_spill] sm:$0xff] %v1337_v14  ;;  %303 = vadd.xlane.f32.xlu2 %v302_v9  ;;  %v1340_v16 = vpop.eup %1001  ;;  %v267_v17 = vmul.f32 %v1337_v14, %v1290_v34 }
  0xa5   :  { %333 = vadd.xlane.f32.xlu0 %v332_v15  ;;  %1007 = vtanh.f32 %v199_v13  ;;  %v262_v21 = vmul.f32 %v1340_v16, %v1290_v34 }
  0xa6   :  { %1009 = vtanh.f32 %v160_v12  ;;  %v320_v24 = vsel %vm277_vm1, %v267_v17, 0.0 }
  0xa7   :  { %v213_v18 = vpop.f32.mrf.mxu3  ;;  %v305_v32 = vsel %vm277_vm1, %v262_v21, 0.0 }
  0xa8   :  { %v1344_v19 = vpop.eup %1003  ;;  %v165_v20 = vpop.f32.mrf.mxu0  ;;  %v214_v22 = vadd.f32 %v1283_v29, %v213_v18 }
  0xa9   :  { %v186_v23 = vpop.f32.mrf.mxu1  ;;  %v272_v25 = vmul.f32 %v1344_v19, %v1290_v34  ;;  %v1352_v26 = vpop.eup %1005  ;;  %v166_v59 = vadd.f32 %v1283_v29, %v165_v20 }
  0xaa   :  { %1903 = vst [vmem:[#allocation7_spill] sm:$0xff] %v1352_v26  ;;  %1011 = vtanh.f32 %v214_v22  ;;  %v201_v33 = vpop.f32.mrf.mxu2  ;;  %v256_v35 = vmul.f32 %v1352_v26, %v1290_v34  ;;  %v187_v46 = vadd.f32 %v1283_v29, %v186_v23 }
  0xab   :  { %v1355_v28 = vpop.eup %1007  ;;  %v335_v30 = vsel %vm277_vm1, %v272_v25, 0.0  ;;  %1013 = vtanh.f32 %v184_v27  ;;  %v202_v39 = vadd.f32 %v1283_v29, %v201_v33 }
  0xac   :  { %1904 = vst [vmem:[#allocation8_spill] sm:$0xff] %v1355_v28  ;;  %v1358_v31 = vpop.eup %1009  ;;  %321 = vadd.xlane.f32.xlu2 %v320_v24  ;;  %336 = vadd.xlane.f32.xlu1 %v335_v30  ;;  %v268_v36 = vmul.f32 %v1355_v28, %v1290_v34  ;;  %v287_v44 = vsel %vm277_vm1, %v256_v35, 0.0 }
  0xad   :  { %306 = vadd.xlane.f32.xlu0 %v305_v32  ;;  %v255_v37 = vmul.f32 %v1358_v31, %v1290_v34  ;;  %1015 = vtanh.f32 %v202_v39 }
  0xae   :  { %v323_v48 = vsel %vm277_vm1, %v268_v36, 0.0 }
  0xaf   :  { %v216_v40 = vpop.f32.mrf.mxu3  ;;  %v284_v49 = vsel %vm277_vm1, %v255_v37, 0.0 }
  0xb0   :  { %v168_v41 = vpop.f32.mrf.mxu0  ;;  %v1369_v45 = vpop.eup %1011  ;;  %v217_v5 = vadd.f32 %v1283_v29, %v216_v40 }
  0xb1   :  { %v189_v43 = vpop.f32.mrf.mxu1  ;;  %1905 = vst [vmem:[#allocation9_spill] sm:$0xff] %v1369_v45  ;;  %v1375_v51 = vpop.eup %1013  ;;  %v273_v52 = vmul.f32 %v1369_v45, %v1290_v34  ;;  %v169_v0 = vadd.f32 %v1283_v29, %v168_v41 }
  0xb2   :  { %v190_v47 = vadd.f32 %v1283_v29, %v189_v43  ;;  %v263_v54 = vmul.f32 %v1375_v51, %v1290_v34 }
  0xb3   :  { %v1381_v58 = vpop.eup %1015  ;;  %v338_v62 = vsel %vm277_vm1, %v273_v52, 0.0 }
  0xb4   :  { %1017 = vtanh.f32 %v190_v47  ;;  %288 = vadd.xlane.f32.xlu1 %v287_v44  ;;  %285 = vadd.xlane.f32.xlu2 %v284_v49  ;;  %1906 = vst [vmem:[#allocation10_spill] sm:$0xff] %v1381_v58  ;;  %v308_v1 = vsel %vm277_vm1, %v263_v54, 0.0  ;;  %v269_v7 = vmul.f32 %v1381_v58, %v1290_v34  ;;  %v350_v49 = vlaneseq }
  0xb5   :  { %324 = vadd.xlane.f32.xlu0 %v323_v48  ;;  %1019 = vtanh.f32 %v187_v46 }
  0xb6   :  { %v326_v12 = vsel %vm277_vm1, %v269_v7, 0.0  ;;  %v351_v52 = vshrl.u32 %v350_v49, 7 }
  0xb7   :  { %v219_v55 = vpop.f32.mrf.mxu3 }
  0xb8   :  { %v171_v56 = vpop.f32.mrf.mxu0  ;;  %v220_v13 = vadd.f32 %v1283_v29, %v219_v55 }
  0xb9   :  { %v172_v61 = vadd.f32 %v1283_v29, %v171_v56  ;;  %v1444_v56 = vadd.s32 16, %v351_v52 }
  0xba   :  { %v1386_v63 = vpop.eup %1017 }
  0xbb   :  { %1021 = vtanh.f32 %v172_v61  ;;  %v265_v2 = vmul.f32 %v1386_v63, %v1290_v34  ;;  %v1392_v3 = vpop.eup %1019  ;;  %vm356_vm2 = vcmp.lt.s32.totalorder %v1444_v56, 17 }
  0xbc   :  { %1907 = vst [vmem:[#allocation11_spill] sm:$0xff] %v1392_v3  ;;  %309 = vadd.xlane.f32.xlu1 %v308_v1  ;;  %339 = vadd.xlane.f32.xlu2 %v338_v62  ;;  %1023 = vtanh.f32 %v166_v59  ;;  %v264_v8 = vmul.f32 %v1392_v3, %v1290_v34 }
  0xbd   :  { %v314_v6 = vsel %vm277_vm1, %v265_v2, 0.0  ;;  %1025 = vtanh.f32 %v169_v0 }
  0xbe   :  { %315 = vadd.xlane.f32.xlu0 %v314_v6  ;;  %1027 = vtanh.f32 %v217_v5  ;;  %v311_v18 = vsel %vm277_vm1, %v264_v8, 0.0 }
  0xbf   :  { %v222_v9 = vpop.f32.mrf.mxu3 }
  0xc0   :  { %v223_v10 = vadd.f32 %v1283_v29, %v222_v9 }
  0xc1   :  { %v1401_v11 = vpop.eup %1021 }
  0xc2   :  { %v259_v15 = vmul.f32 %v1401_v11, %v1290_v34  ;;  %v1407_v17 = vpop.eup %1023  ;;  %1029 = vtanh.f32 %v223_v10 }
  0xc3   :  { %1908 = vst [vmem:[#allocation12_spill] sm:$0xff] %v1407_v17  ;;  %v1410_v20 = vpop.eup %1025  ;;  %1031 = vtanh.f32 %v220_v13  ;;  %v257_v29 = vmul.f32 %v1407_v17, %v1290_v34 }
  0xc4   :  { %1909 = vst [vmem:[#allocation13_spill] sm:$0xff] %v1410_v20  ;;  %327 = vadd.xlane.f32.xlu1 %v326_v12  ;;  %312 = vadd.xlane.f32.xlu2 %v311_v18  ;;  %v296_v21 = vsel %vm277_vm1, %v259_v15, 0.0  ;;  %v1413_v22 = vpop.eup %1027  ;;  %v258_v23 = vmul.f32 %v1410_v20, %v1290_v34 }
  0xc5   :  { %1910 = vst [vmem:[#allocation14_spill] sm:$0xff] %v1413_v22  ;;  %v274_v24 = vmul.f32 %v1413_v22, %v1290_v34  ;;  %v290_v27 = vsel %vm277_vm1, %v257_v29, 0.0 }
  0xc6   :  { %297 = vadd.xlane.f32.xlu0 %v296_v21  ;;  %v293_v30 = vsel %vm277_vm1, %v258_v23, 0.0 }
  0xc7   :  { %v341_v33 = vsel %vm277_vm1, %v274_v24, 0.0 }
  0xc8   :  { %v1421_v25 = vpop.eup %1029 }
  0xc9   :  { %1911 = vst [vmem:[#allocation15_spill] sm:$0xff] %v1421_v25  ;;  %v1425_v32 = vpop.eup %1031  ;;  %v276_v35 = vmul.f32 %v1421_v25, %v1290_v34 }
  0xca   :  { %1912 = vst [vmem:[#allocation16_spill] sm:$0xff] %v1425_v32  ;;  %v275_v36 = vmul.f32 %v1425_v32, %v1290_v34 }
  0xcb   :  { %v347_v37 = vsel %vm277_vm1, %v276_v35, 0.0 }
  0xcc   :  { %291 = vadd.xlane.f32.xlu1 %v290_v27  ;;  %294 = vadd.xlane.f32.xlu2 %v293_v30  ;;  %v344_v39 = vsel %vm277_vm1, %v275_v36, 0.0 }
  0xce   :  { %342 = vadd.xlane.f32.xlu0 %v341_v33 }
  0xd4   :  { %345 = vadd.xlane.f32.xlu1 %v344_v39  ;;  %348 = vadd.xlane.f32.xlu2 %v347_v37 }
 0x108   :  { %v280_v40 = vpop.xlane.xlu0 %279 }
 0x109   :  { %v1434_v41 = vpop.xlane.xlu1 %300 }
 0x10f   :  { %v331_v43 = vpop.xlane.xlu2 %330 }
 0x110   :  { %v283_v44 = vpop.xlane.xlu0 %282  ;;  %v1470_v35 = vsel %vm356_vm2, %v331_v43, -1e+30 }
 0x111   :  { %v387_v59 = vmax.f32 %v280_v40, %v283_v44 }
 0x112   :  { %v1436_v46 = vpop.xlane.xlu1 %318 }
 0x117   :  { %v304_v47 = vpop.xlane.xlu2 %303 }
 0x118   :  { %v1438_v48 = vpop.xlane.xlu0 %333 }
 0x11f   :  { %v322_v54 = vpop.xlane.xlu2 %321  ;;  %v1440_v34 = vpop.xlane.xlu1 %336 }
 0x120   :  { %v1442_v55 = vpop.xlane.xlu0 %306  ;;  %v435_v7 = vmax.f32 %v1438_v48, %v1440_v34  ;;  %v1465_v29 = vsel %vm356_vm2, %v322_v54, -1e+30 }
 0x127   :  { %v1447_v61 = vpop.xlane.xlu1 %288  ;;  %v286_v62 = vpop.xlane.xlu2 %285 }
 0x128   :  { %v365_v0 = vsel %vm356_vm2, %v286_v62, -1e+30  ;;  %v1451_v1 = vpop.xlane.xlu0 %324 }
 0x129   :  { %v388_v2 = vmax.f32 %v387_v59, %v365_v0 }
 0x12b   :  { %v389_v5 = vrot.slane %v388_v2, 4 }
 0x12d   :  { %v390_v6 = vmax.f32 %v388_v2, %v389_v5 }
 0x12f   :  { %v391_v8 = vrot.slane %v390_v6, 2  ;;  %v1455_v9 = vpop.xlane.xlu1 %309  ;;  %v340_v10 = vpop.xlane.xlu2 %339 }
 0x130   :  { %v1459_v12 = vsel %vm356_vm2, %v340_v10, -1e+30  ;;  %v411_v54 = vmax.f32 %v1442_v55, %v1455_v9 }
 0x131   :  { %v392_v13 = vmax.f32 %v390_v6, %v391_v8  ;;  %v436_v15 = vmax.f32 %v435_v7, %v1459_v12  ;;  %v316_v18 = vpop.xlane.xlu0 %315 }
 0x132   :  { %v419_v21 = vmax.f32 %v316_v18, %v1436_v46 }
 0x133   :  { %v393_v23 = vrot.slane %v392_v13, 1  ;;  %v437_v24 = vrot.slane %v436_v15, 4 }
 0x134   :  { %v420_v27 = vmax.f32 %v419_v21, %v1465_v29  ;;  %v1490_v21 = vsel %vm356_vm2, %v304_v47, -1e+30 }
 0x135   :  { %v394_v30 = vmax.f32 %v392_v13, %v393_v23  ;;  %v438_v33 = vmax.f32 %v436_v15, %v437_v24 }
 0x136   :  { %v421_v36 = vrot.slane %v420_v27, 4 }
 0x137   :  { %v451_v37 = vsub.f32 %v280_v40, %v394_v30  ;;  %v452_v39 = vsub.f32 %v283_v44, %v394_v30  ;;  %v453_v49 = vsub.f32 %v365_v0, %v394_v30  ;;  %v439_v52 = vrot.slane %v438_v33, 2  ;;  %v1472_v59 = vpop.xlane.xlu1 %327  ;;  %v313_v62 = vpop.xlane.xlu2 %312 }
 0x138   :  { %v422_v2 = vmax.f32 %v420_v27, %v421_v36  ;;  %v427_v5 = vmax.f32 %v1451_v1, %v1472_v59  ;;  %v1480_v6 = vsel %vm356_vm2, %v313_v62, -1e+30 }
 0x139   :  { %v475_v43 = vmul.f32 1.442695, %v451_v37  ;;  %v477_v7 = vmul.f32 1.442695, %v452_v39  ;;  %v479_v40 = vmul.f32 1.442695, %v453_v49  ;;  %v440_v44 = vmax.f32 %v438_v33, %v439_v52  ;;  %v1482_v0 = vpop.xlane.xlu0 %297 }
 0x13a   :  { %v423_v8 = vrot.slane %v422_v2, 2  ;;  %v428_v10 = vmax.f32 %v427_v5, %v1470_v35  ;;  %v412_v13 = vmax.f32 %v411_v54, %v1480_v6  ;;  %v403_v15 = vmax.f32 %v1482_v0, %v1434_v41 }
 0x13b   :  { %1033 = vpow2.f32 %v475_v43  ;;  %v441_v23 = vrot.slane %v440_v44, 1 }
 0x13c   :  { %1035 = vpow2.f32 %v477_v7  ;;  %v424_v24 = vmax.f32 %v422_v2, %v423_v8  ;;  %v429_v27 = vrot.slane %v428_v10, 4  ;;  %v413_v30 = vrot.slane %v412_v13, 4 }
 0x13d   :  { %1037 = vpow2.f32 %v479_v40  ;;  %v404_v33 = vmax.f32 %v403_v15, %v1490_v21  ;;  %v442_v36 = vmax.f32 %v440_v44, %v441_v23 }
 0x13e   :  { %v425_v37 = vrot.slane %v424_v24, 1  ;;  %v430_v39 = vmax.f32 %v428_v10, %v429_v27  ;;  %v414_v49 = vmax.f32 %v412_v13, %v413_v30 }
 0x13f   :  { %v405_v52 = vrot.slane %v404_v33, 4  ;;  %v469_v2 = vsub.f32 %v1438_v48, %v442_v36  ;;  %v470_v23 = vsub.f32 %v1440_v34, %v442_v36 }
 0x140   :  { %v426_v62 = vmax.f32 %v424_v24, %v425_v37  ;;  %v431_v54 = vrot.slane %v430_v39, 2  ;;  %v415_v5 = vrot.slane %v414_v49, 2 }
 0x141   :  { %v1493_v25 = vpop.eup %1033  ;;  %v406_v47 = vmax.f32 %v404_v33, %v405_v52  ;;  %v511_v48 = vmul.f32 1.442695, %v469_v2  ;;  %v513_v32 = vmul.f32 1.442695, %v470_v23 }
 0x142   :  { %v1495_v43 = vpop.eup %1035  ;;  %v463_v7 = vsub.f32 %v316_v18, %v426_v62  ;;  %v464_v40 = vsub.f32 %v1436_v46, %v426_v62  ;;  %v432_v8 = vmax.f32 %v430_v39, %v431_v54  ;;  %v416_v10 = vmax.f32 %v414_v49, %v415_v5 }
 0x143   :  { %v1499_v15 = vpop.eup %1037  ;;  %v523_v44 = vadd.f32 %v1495_v43, %v1493_v25  ;;  %v407_v13 = vrot.slane %v406_v47, 2  ;;  %v465_v18 = vsub.f32 %v1465_v29, %v426_v62  ;;  %v471_v5 = vsub.f32 %v1459_v12, %v442_v36  ;;  %v1514_v12 = vpop.xlane.xlu1 %291 }
 0x144   :  { %v499_v24 = vmul.f32 1.442695, %v463_v7  ;;  %v501_v27 = vmul.f32 1.442695, %v464_v40  ;;  %v433_v33 = vrot.slane %v432_v8, 1  ;;  %v417_v37 = vrot.slane %v416_v10, 1 }
 0x145   :  { %v524_v30 = vadd.f32 %v1499_v15, %v523_v44  ;;  %v408_v46 = vmax.f32 %v406_v47, %v407_v13  ;;  %v503_v34 = vmul.f32 1.442695, %v465_v18  ;;  %v295_v13 = vpop.xlane.xlu2 %294 }
 0x146   :  { %1039 = vpow2.f32 %v499_v24  ;;  %v434_v52 = vmax.f32 %v432_v8, %v433_v33  ;;  %v418_v54 = vmax.f32 %v416_v10, %v417_v37  ;;  %v395_v24 = vmax.f32 %v1447_v61, %v1514_v12 }
 0x147   :  { %v525_v39 = vrot.slane %v524_v30, 4  ;;  %1041 = vpow2.f32 %v501_v27  ;;  %v409_v49 = vrot.slane %v408_v46, 1 }
 0x148   :  { %v460_v7 = vsub.f32 %v1442_v55, %v418_v54  ;;  %v461_v40 = vsub.f32 %v1455_v9, %v418_v54  ;;  %1043 = vpow2.f32 %v511_v48  ;;  %v466_v29 = vsub.f32 %v1451_v1, %v434_v52 }
 0x149   :  { %v410_v44 = vmax.f32 %v408_v46, %v409_v49  ;;  %v526_v22 = vadd.f32 %v525_v39, %v524_v30  ;;  %1045 = vpow2.f32 %v513_v32  ;;  %v462_v62 = vsub.f32 %v1480_v6, %v418_v54 }
 0x14a   :  { %v493_v47 = vmul.f32 1.442695, %v460_v7  ;;  %v467_v8 = vsub.f32 %v1472_v59, %v434_v52  ;;  %v495_v10 = vmul.f32 1.442695, %v461_v40  ;;  %v515_v55 = vmul.f32 1.442695, %v471_v5 }
 0x14b   :  { %1047 = vpow2.f32 %v503_v34  ;;  %v457_v9 = vsub.f32 %v1482_v0, %v410_v44  ;;  %v527_v23 = vrot.slane %v526_v22, 2  ;;  %v505_v1 = vmul.f32 1.442695, %v466_v29 }
 0x14c   :  { %v1511_v2 = vpop.eup %1039  ;;  %v458_v32 = vsub.f32 %v1434_v41, %v410_v44  ;;  %1049 = vpow2.f32 %v493_v47  ;;  %v497_v6 = vmul.f32 1.442695, %v462_v62  ;;  %v507_v30 = vmul.f32 1.442695, %v467_v8 }
 0x14d   :  { %v1516_v36 = vpop.eup %1041  ;;  %1051 = vpow2.f32 %v495_v10  ;;  %v1528_v0 = vsel %vm356_vm2, %v295_v13, -1e+30  ;;  %v487_v41 = vmul.f32 1.442695, %v457_v9  ;;  %v528_v37 = vadd.f32 %v527_v23, %v526_v22  ;;  %v349_v28 = vpop.xlane.xlu2 %348 }
 0x14e   :  { %v1522_v59 = vpop.eup %1043  ;;  %v555_v27 = vadd.f32 %v1516_v36, %v1511_v2  ;;  %1053 = vpow2.f32 %v515_v55  ;;  %v489_v48 = vmul.f32 1.442695, %v458_v32  ;;  %v468_v46 = vsub.f32 %v1470_v35, %v434_v52 }
 0x14f   :  { %v1530_v33 = vpop.eup %1045  ;;  %1055 = vpow2.f32 %v505_v1  ;;  %v396_v39 = vmax.f32 %v395_v24, %v1528_v0  ;;  %v459_v5 = vsub.f32 %v1490_v21, %v410_v44  ;;  %v529_v7 = vrot.slane %v528_v37, 1 }
 0x150   :  { %1057 = vpow2.f32 %v497_v6  ;;  %v571_v54 = vadd.f32 %v1530_v33, %v1522_v59  ;;  %v509_v35 = vmul.f32 1.442695, %v468_v46 }
 0x151   :  { %v1532_v18 = vpop.eup %1047  ;;  %1059 = vpow2.f32 %v507_v30  ;;  %v397_v29 = vrot.slane %v396_v39, 4  ;;  %v491_v21 = vmul.f32 1.442695, %v459_v5  ;;  %v1555_v55 = vadd.f32 %v529_v7, %v528_v37 }
 0x152   :  { %v556_v49 = vadd.f32 %v1532_v18, %v555_v27  ;;  %v1540_v34 = vpop.eup %1049  ;;  %1061 = vpow2.f32 %v487_v41 }
 0x153   :  { %v1542_v22 = vpop.eup %1051  ;;  %1063 = vpow2.f32 %v489_v48  ;;  %v398_v23 = vmax.f32 %v396_v39, %v397_v29  ;;  %vm592_vm4 = vweird.f32 %v1555_v55 }
 0x154   :  { %v1544_v40 = vpop.eup %1053  ;;  %v547_v52 = vadd.f32 %v1542_v22, %v1540_v34  ;;  %v557_v8 = vrot.slane %v556_v49, 4  ;;  %1065 = vpow2.f32 %v509_v35 }
 0x155   :  { %v1548_v62 = vpop.eup %1055  ;;  %v572_v47 = vadd.f32 %v1544_v40, %v571_v54  ;;  %1067 = vpow2.f32 %v491_v21  ;;  %v399_v41 = vrot.slane %v398_v23, 2 }
 0x156   :  { %v1551_v44 = vpop.eup %1057  ;;  %v558_v6 = vadd.f32 %v557_v8, %v556_v49  ;;  %1069 = vrcp.f32 %v1555_v55 }
 0x157   :  { %v1553_v10 = vpop.eup %1059  ;;  %v548_v9 = vadd.f32 %v1551_v44, %v547_v52  ;;  %v573_v32 = vrot.slane %v572_v47, 4  ;;  %v400_v7 = vmax.f32 %v398_v23, %v399_v41  ;;  %v1576_v41 = vpop.xlane.xlu1 %345 }
 0x158   :  { %v1558_v13 = vpop.eup %1061  ;;  %v563_v24 = vadd.f32 %v1553_v10, %v1548_v62  ;;  %v559_v48 = vrot.slane %v558_v6, 2 }
 0x159   :  { %v1560_v1 = vpop.eup %1063  ;;  %v549_v27 = vrot.slane %v548_v9, 4  ;;  %v574_v37 = vadd.f32 %v573_v32, %v572_v47  ;;  %v401_v47 = vrot.slane %v400_v7, 1 }
 0x15a   :  { %v539_v30 = vadd.f32 %v1560_v1, %v1558_v13  ;;  %v1567_v46 = vpop.eup %1065  ;;  %v560_v29 = vadd.f32 %v559_v48, %v558_v6 }
 0x15b   :  { %1913 = vst [vmem:[#allocation17_spill] sm:$0xff] %v1567_v46  ;;  %v1569_v39 = vpop.eup %1067  ;;  %v564_v54 = vadd.f32 %v1567_v46, %v563_v24  ;;  %v550_v49 = vadd.f32 %v549_v27, %v548_v9  ;;  %v575_v52 = vrot.slane %v574_v37, 2  ;;  %v402_v24 = vmax.f32 %v400_v7, %v401_v47 }
 0x15c   :  { %v540_v5 = vadd.f32 %v1569_v39, %v539_v30  ;;  %v1070_v35 = vpop.eup %1069  ;;  %v561_v20 = vrot.slane %v560_v29, 1  ;;  %v596_v7 = vand.u32 2147483647, %v1555_v55 }
 0x15d   :  { %v565_v8 = vrot.slane %v564_v54, 4  ;;  %v551_v21 = vrot.slane %v550_v49, 2  ;;  %v588_v45 = vmul.f32 %v1070_v35, %v1555_v55  ;;  %v576_v32 = vadd.f32 %v575_v52, %v574_v37  ;;  %v1582_v37 = vpop.xlane.xlu0 %342 }
 0x15e   :  { %v541_v50 = vrot.slane %v540_v5, 4  ;;  %v1574_v27 = vadd.f32 %v561_v20, %v560_v29  ;;  %v454_v46 = vsub.f32 %v1447_v61, %v402_v24  ;;  %vm593_vm3 = vweird.f32 %v1070_v35 }
 0x15f   :  { %v566_v17 = vadd.f32 %v565_v8, %v564_v54  ;;  %v552_v26 = vadd.f32 %v551_v21, %v550_v49  ;;  %v589_v3 = vsub.f32 1.0, %v588_v45  ;;  %v577_v9 = vrot.slane %v576_v32, 1  ;;  %vm1600_vm5 = vmor %vm592_vm4, %vm593_vm3 }
 0x160   :  { %v542_v58 = vadd.f32 %v541_v50, %v540_v5  ;;  %1071 = vrcp.f32 %v1574_v27  ;;  %v443_v50 = vmax.f32 %v1582_v37, %v1576_v41  ;;  %v455_v49 = vsub.f32 %v1514_v12, %v402_v24 }
 0x161   :  { %v567_v23 = vrot.slane %v566_v17, 2  ;;  %v553_v30 = vrot.slane %v552_v26, 1  ;;  %v590_v6 = vmul.f32 %v1070_v35, %v589_v3  ;;  %v1579_v14 = vadd.f32 %v577_v9, %v576_v32 }
 0x162   :  { %v543_v48 = vrot.slane %v542_v58, 2  ;;  %v1590_v3 = vsel %vm356_vm2, %v349_v28, -1e+30  ;;  %v481_v5 = vmul.f32 1.442695, %v454_v46  ;;  %v598_v52 = vand.u32 2147483648, %v1555_v55 }
 0x163   :  { %v568_v45 = vadd.f32 %v567_v23, %v566_v17  ;;  %v1586_v20 = vadd.f32 %v553_v30, %v552_v26  ;;  %v591_v54 = vadd.f32 %v1070_v35, %v590_v6  ;;  %1073 = vrcp.f32 %v1579_v14 }
 0x164   :  { %v544_v61 = vadd.f32 %v543_v48, %v542_v58  ;;  %v456_v26 = vsub.f32 %v1528_v0, %v402_v24  ;;  %v444_v56 = vmax.f32 %v443_v50, %v1590_v3  ;;  %v483_v29 = vmul.f32 1.442695, %v455_v49 }
 0x165   :  { %v569_v58 = vrot.slane %v568_v45, 1  ;;  %1075 = vrcp.f32 %v1586_v20  ;;  %v595_v12 = vsel %vm1600_vm5, %v1070_v35, %v591_v54  ;;  %vm597_vm6 = vcmp.eq.f32.partialorder %v596_v7, 8.507059e+37 }
 0x166   :  { %v1598_v17 = vpop.eup %1071  ;;  %v545_v46 = vrot.slane %v544_v61, 1  ;;  %1077 = vpow2.f32 %v481_v5  ;;  %v599_v55 = vor.u32 1.1754944e-38, %v598_v52  ;;  %v485_v21 = vmul.f32 1.442695, %v456_v26 }
 0x167   :  { %v656_v0 = vmul.f32 %v1598_v17, %v1574_v27  ;;  %1079 = vpow2.f32 %v483_v29  ;;  %v1614_v24 = vadd.f32 %v569_v58, %v568_v45  ;;  %v445_v9 = vrot.slane %v444_v56, 4 }
 0x168   :  { %v1610_v8 = vadd.f32 %v545_v46, %v544_v61  ;;  %v600_v32 = vsel %vm597_vm6, %v599_v55, %v595_v12  ;;  %v700_v50 = vand.u32 2147483648, %v1579_v14  ;;  %v666_v49 = vand.u32 2147483648, %v1574_v27 }
 0x169   :  { %v1612_v47 = vpop.eup %1073  ;;  %v601_v30 = vmul.f32 %v1493_v25, %v600_v32  ;;  %v657_v48 = vsub.f32 1.0, %v656_v0  ;;  %v446_v45 = vmax.f32 %v444_v56, %v445_v9  ;;  %v602_v61 = vmul.f32 %v1495_v43, %v600_v32 }
 0x16a   :  { %1081 = vrcp.f32 %v1610_v8  ;;  %v690_v6 = vmul.f32 %v1612_v47, %v1579_v14  ;;  %v603_v25 = vmul.f32 %v1499_v15, %v600_v32  ;;  %v698_v7 = vand.u32 2147483647, %v1579_v14 }
 0x16b   :  { %v1617_v35 = vpop.eup %1075  ;;  %1083 = vpow2.f32 %v485_v21  ;;  %v447_v26 = vrot.slane %v446_v45, 2  ;;  %v723_v58 = vmul.f32 %v1293_v38, %v601_v30  ;;  %v658_v12 = vmul.f32 %v1598_v17, %v657_v48 }
 0x16c   :  { %v1619_v23 = vpop.eup %1077  ;;  %1085 = vrcp.f32 %v1614_v24  ;;  %v639_v5 = vmul.f32 %v1617_v35, %v1586_v20  ;;  %v691_v56 = vsub.f32 1.0, %v690_v6  ;;  %v664_v43 = vand.u32 2147483647, %v1574_v27 }
 0x16d   :  { %v1626_v54 = vpop.eup %1079  ;;  %v1639_v46 = vor.u32 1.1754944e-38, %v700_v50  ;;  %vm660_vm7 = vweird.f32 %v1574_v27  ;;  %v448_v29 = vmax.f32 %v446_v45, %v447_v26  ;;  %v724_v0 = vmul.f32 %v1309_v53, %v602_v61 }
 0x16e   :  { %v531_v52 = vadd.f32 %v1626_v54, %v1619_v23  ;;  %vm695_vm8 = vweird.f32 %v1612_v47  ;;  %v667_v21 = vor.u32 1.1754944e-38, %v666_v49  ;;  %v640_v38 = vsub.f32 1.0, %v639_v5 }
 0x16f   :  { %v725_v9 = vmul.f32 %v1358_v31, %v603_v25  ;;  %vm694_vm9 = vweird.f32 %v1579_v14  ;;  %v449_v48 = vrot.slane %v448_v29, 1  ;;  %v747_v50 = vsel %vm277_vm1, %v723_v58, 0.0 }
 0x170   :  { %v1082_v28 = vpop.eup %1081  ;;  %v692_v45 = vmul.f32 %v1612_v47, %v691_v56  ;;  %v659_v53 = vadd.f32 %v1598_v17, %v658_v12  ;;  %vm661_vm10 = vweird.f32 %v1598_v17  ;;  %vm1656_vm11 = vcmp.eq.f32.partialorder %v664_v43, 8.507059e+37  ;;  %vm1699_vm4 = vmor %vm694_vm9, %vm695_vm8 }
 0x171   :  { %v622_v15 = vmul.f32 %v1082_v28, %v1610_v8  ;;  %v1643_v55 = vpop.eup %1083  ;;  %vm627_vm12 = vweird.f32 %v1082_v28  ;;  %v450_v5 = vmax.f32 %v448_v29, %v449_v48  ;;  %vm626_vm13 = vweird.f32 %v1610_v8  ;;  %vm1684_vm0 = vmor %vm660_vm7, %vm661_vm10 }
 0x172   :  { %v1647_v32 = vpop.eup %1085  ;;  %v532_v6 = vadd.f32 %v1643_v55, %v531_v52  ;;  %v641_v52 = vmul.f32 %v1617_v35, %v640_v38  ;;  %v632_v26 = vand.u32 2147483648, %v1610_v8  ;;  %v630_v56 = vand.u32 2147483647, %v1610_v8  ;;  %vm1673_vm15 = vmor %vm626_vm13, %vm627_vm12 }
 0x173   :  { %v623_v30 = vsub.f32 1.0, %v622_v15  ;;  %v673_v25 = vmul.f32 %v1647_v32, %v1614_v24  ;;  %v472_v43 = vsub.f32 %v1582_v37, %v450_v5  ;;  %v748_v15 = vsel %vm277_vm1, %v724_v0, 0.0 }
 0x174   :  { %v533_v31 = vrot.slane %v532_v6, 4  ;;  %vm1669_vm14 = vcmp.eq.f32.partialorder %v698_v7, 8.507059e+37  ;;  %v473_v48 = vsub.f32 %v1576_v41, %v450_v5  ;;  %v693_v8 = vadd.f32 %v1612_v47, %v692_v45 }
 0x175   :  { %v624_v49 = vmul.f32 %v1082_v28, %v623_v30  ;;  %v750_v30 = vsel %vm277_vm1, %v725_v9, 0.0  ;;  %v517_v9 = vmul.f32 1.442695, %v472_v43  ;;  %v663_v41 = vsel %vm1684_vm0, %v1598_v17, %v659_v53 }
 0x176   :  { %v534_v12 = vadd.f32 %v533_v31, %v532_v6  ;;  %v633_v6 = vor.u32 1.1754944e-38, %v632_v26  ;;  %v519_v45 = vmul.f32 1.442695, %v473_v48  ;;  %v749_v31 = vadd.f32 %v748_v15, %v747_v50 }
 0x177   :  { %v625_v58 = vadd.f32 %v1082_v28, %v624_v49  ;;  %v474_v49 = vsub.f32 %v1590_v3, %v450_v5  ;;  %v674_v3 = vsub.f32 1.0, %v673_v25  ;;  %v642_v5 = vadd.f32 %v1617_v35, %v641_v52 }
 0x178   :  { %v535_v0 = vrot.slane %v534_v12, 2  ;;  %vm644_vm2 = vweird.f32 %v1617_v35  ;;  %vm631_vm3 = vcmp.eq.f32.partialorder %v630_v56, 8.507059e+37  ;;  %1087 = vpow2.f32 %v517_v9 }
 0x179   :  { %v629_v7 = vsel %vm1673_vm15, %v1082_v28, %v625_v58  ;;  %v521_v17 = vmul.f32 1.442695, %v474_v49  ;;  %v697_v50 = vsel %vm1699_vm4, %v1612_v47, %v693_v8  ;;  %v668_v53 = vsel %vm1656_vm11, %v667_v21, %v663_v41 }
 0x17a   :  { %v634_v28 = vsel %vm631_vm3, %v633_v6, %v629_v7  ;;  %v536_v58 = vadd.f32 %v535_v0, %v534_v12  ;;  %vm643_vm5 = vweird.f32 %v1586_v20  ;;  %v649_v25 = vand.u32 2147483648, %v1586_v20 }
 0x17b   :  { %v675_v14 = vmul.f32 %v1647_v32, %v674_v3  ;;  %v647_v52 = vand.u32 2147483647, %v1586_v20  ;;  %1089 = vpow2.f32 %v519_v45  ;;  %v681_v56 = vand.u32 2147483647, %v1614_v24  ;;  %vm1716_vm6 = vmor %vm643_vm5, %vm644_vm2 }
 0x17c   :  { %v537_v26 = vrot.slane %v536_v58, 1  ;;  %v683_v12 = vand.u32 2147483648, %v1614_v24  ;;  %v635_v21 = vmul.f32 %v1558_v13, %v634_v28  ;;  %v636_v61 = vmul.f32 %v1560_v1, %v634_v28 }
 0x17d   :  { %v751_v43 = vadd.f32 %v750_v30, %v749_v31  ;;  %v646_v20 = vsel %vm1716_vm6, %v1617_v35, %v642_v5  ;;  %1091 = vpow2.f32 %v521_v17  ;;  %v702_v38 = vsel %vm1669_vm14, %v1639_v46, %v697_v50 }
 0x17e   :  { %v1725_v15 = vadd.f32 %v537_v26, %v536_v58  ;;  %v669_v48 = vmul.f32 %v1511_v2, %v668_v53  ;;  %vm678_vm7 = vweird.f32 %v1647_v32  ;;  %v650_v49 = vor.u32 1.1754944e-38, %v649_v25  ;;  %v1732_v13 = vpop.eup %1087 }
 0x17f   :  { %v670_v1 = vmul.f32 %v1516_v36, %v668_v53  ;;  %v676_v30 = vadd.f32 %v1647_v32, %v675_v14  ;;  %vm648_vm8 = vcmp.eq.f32.partialorder %v647_v52, 8.507059e+37  ;;  %v729_v8 = vmul.f32 %v1401_v11, %v635_v21 }
 0x180   :  { %1093 = vrcp.f32 %v1725_v15  ;;  %v651_v35 = vsel %vm648_vm8, %v650_v49, %v646_v20  ;;  %v730_v29 = vmul.f32 %v1296_v42, %v636_v61  ;;  %v752_v2 = vrot.slane %v751_v43, 4 }
 0x181   :  { %v1739_v46 = vpop.eup %1089  ;;  %v703_v37 = vmul.f32 %v1522_v59, %v702_v38  ;;  %vm677_vm9 = vweird.f32 %v1614_v24  ;;  %v637_v7 = vmul.f32 %v1569_v39, %v634_v28  ;;  %v704_v36 = vmul.f32 %v1530_v33, %v702_v38 }
 0x182   :  { %vm1747_vm10 = vmor %vm677_vm9, %vm678_vm7  ;;  %vm1751_vm11 = vcmp.eq.f32.partialorder %v681_v56, 8.507059e+37  ;;  %v684_v42 = vor.u32 1.1754944e-38, %v683_v12  ;;  %v579_v59 = vadd.f32 %v1739_v46, %v1732_v13  ;;  %v735_v39 = vmul.f32 %v1386_v63, %v669_v48  ;;  %v1932_v48 = vld [vmem:[#allocation6_spill] sm:$0xff] }
 0x183   :  { %v1757_v9 = vpop.eup %1091  ;;  %v736_v33 = vmul.f32 %v1318_v60, %v670_v1  ;;  %v680_v24 = vsel %vm1747_vm10, %v1647_v32, %v676_v30  ;;  %v652_v41 = vmul.f32 %v1540_v34, %v651_v35  ;;  %v653_v3 = vmul.f32 %v1542_v22, %v651_v35  ;;  %v1933_v30 = vld [vmem:[#allocation8_spill] sm:$0xff] }
 0x184   :  { %v769_v6 = vsel %vm277_vm1, %v729_v8, 0.0  ;;  %v770_v45 = vsel %vm277_vm1, %v730_v29, 0.0  ;;  %v580_v31 = vadd.f32 %v1757_v9, %v579_v59  ;;  %v1769_v27 = vadd.f32 %v752_v2, %v751_v43  ;;  %v1934_v2 = vld [vmem:[#allocation10_spill] sm:$0xff] }
 0x185   :  { %v1772_v63 = vmul.f32 %v1544_v40, %v702_v38  ;;  %v741_v60 = vmul.f32 %v1328_v4, %v703_v37  ;;  %v731_v32 = vmul.f32 %v1313_v57, %v637_v7  ;;  %v742_v34 = vmul.f32 %v1344_v19, %v704_v36  ;;  %v836_v4 = vld [vmem:[%s1883_s4 + $0x8] sm:$0xff]  ;;  %v835_v57 = vld [vmem:[%s1883_s4] sm:$0xff]  ;;  %v1935_v7 = vld [vmem:[#allocation11_spill] sm:$0xff] }
 0x186   :  { %v1094_v5 = vpop.eup %1093  ;;  %v685_v22 = vsel %vm1751_vm11, %v684_v42, %v680_v24  ;;  %v581_v58 = vrot.slane %v580_v31, 4  ;;  %v671_v17 = vmul.f32 %v1532_v18, %v668_v53  ;;  %v791_v50 = vsel %vm277_vm1, %v735_v39, 0.0  ;;  %879 = vmatpush.msrb.mxu1 %v836_v4 }
 0x187   :  { %v605_v28 = vmul.f32 %v1094_v5, %v1725_v15  ;;  %v732_v25 = vmul.f32 %v1340_v16, %v652_v41  ;;  %v771_v40 = vadd.f32 %v770_v45, %v769_v6  ;;  %v792_v19 = vsel %vm277_vm1, %v736_v33, 0.0  ;;  %v1936_v6 = vld [vmem:[#allocation17_spill] sm:$0xff] }
 0x188   :  { %v733_v14 = vmul.f32 %v1375_v51, %v653_v3  ;;  %v582_v26 = vadd.f32 %v581_v58, %v580_v31  ;;  %v686_v18 = vmul.f32 %v1548_v62, %v685_v22  ;;  %v687_v16 = vmul.f32 %v1553_v10, %v685_v22  ;;  %880 = vmatpush.msrb.mxu1 %v835_v57  ;;  %v1937_v31 = vld [vmem:[#allocation7_spill] sm:$0xff]  ;;  %v1939_v58 = vld [vmem:[#allocation13_spill] sm:$0xff] }
 0x189   :  { %v606_v52 = vsub.f32 1.0, %v605_v28  ;;  %v772_v53 = vsel %vm277_vm1, %v731_v32, 0.0  ;;  %v615_v56 = vand.u32 2147483648, %v1725_v15  ;;  %vm610_vm12 = vweird.f32 %v1094_v5  ;;  %v1938_v32 = vld [vmem:[#allocation12_spill] sm:$0xff] }
 0x18a   :  { %v613_v47 = vand.u32 2147483647, %v1725_v15  ;;  %v583_v21 = vrot.slane %v582_v26, 2  ;;  %v754_v61 = vrot.slane %v1769_v27, 2  ;;  %v654_v51 = vmul.f32 %v1551_v44, %v651_v35 }
 0x18b   :  { %v607_v12 = vmul.f32 %v1094_v5, %v606_v52  ;;  %v780_v43 = vsel %vm277_vm1, %v732_v25, 0.0  ;;  %v773_v20 = vadd.f32 %v772_v53, %v771_v40  ;;  %v781_v62 = vsel %vm277_vm1, %v733_v14, 0.0  ;;  %v1940_v40 = vld [vmem:[#allocation5_spill] sm:$0xff] }
 0x18c   :  { %vm609_vm13 = vweird.f32 %v1725_v15  ;;  %v584_v38 = vadd.f32 %v583_v21, %v582_v26  ;;  %v737_v49 = vmul.f32 %v1932_v48, %v671_v17  ;;  %v793_v1 = vadd.f32 %v792_v19, %v791_v50  ;;  %v1941_v19 = vld [vmem:[#allocation9_spill] sm:$0xff] }
 0x18d   :  { %v608_v10 = vadd.f32 %v1094_v5, %v607_v12  ;;  %v738_v8 = vmul.f32 %v1933_v30, %v686_v18  ;;  %vm611_vm14 = vmor %vm609_vm13, %vm610_vm12  ;;  %v616_v29 = vor.u32 1.1754944e-38, %v615_v56  ;;  %v739_v37 = vmul.f32 %v1934_v2, %v687_v16 }
 0x18e   :  { %vm614_vm15 = vcmp.eq.f32.partialorder %v613_v47, 8.507059e+37  ;;  %v585_v35 = vrot.slane %v584_v38, 1  ;;  %v734_v36 = vmul.f32 %v1935_v7, %v654_v51  ;;  %v782_v0 = vadd.f32 %v781_v62, %v780_v43  ;;  %v892_v62 = vld [vmem:[%s1885_s6 + $0x30] sm:$0xff]  ;;  %v890_v7 = vld [vmem:[%s1885_s6 + $0x20] sm:$0xff] }
 0x18f   :  { %v612_v44 = vsel %vm611_vm14, %v1094_v5, %v608_v10  ;;  %v774_v11 = vrot.slane %v773_v20, 4  ;;  %v813_v24 = vsel %vm277_vm1, %v741_v60, 0.0  ;;  %v814_v41 = vsel %vm277_vm1, %v742_v34, 0.0 }
 0x190   :  { %v617_v42 = vsel %vm614_vm15, %v616_v29, %v612_v44  ;;  %v1809_v33 = vadd.f32 %v585_v35, %v584_v38  ;;  %v794_v3 = vsel %vm277_vm1, %v737_v49, 0.0  ;;  %v688_v45 = vmul.f32 %v1936_v6, %v685_v22 }
 0x191   :  { %v618_v15 = vmul.f32 %v1619_v23, %v617_v42  ;;  %v619_v59 = vmul.f32 %v1626_v54, %v617_v42  ;;  %v620_v39 = vmul.f32 %v1643_v55, %v617_v42  ;;  %v795_v54 = vadd.f32 %v794_v3, %v793_v1  ;;  %v891_v1 = vld [vmem:[%s1885_s6 + $0x28] sm:$0xff] }
 0x192   :  { %1095 = vrcp.f32 %v1809_v33  ;;  %v802_v55 = vsel %vm277_vm1, %v738_v8, 0.0  ;;  %v803_v17 = vsel %vm277_vm1, %v739_v37, 0.0  ;;  %v783_v60 = vsel %vm277_vm1, %v734_v36, 0.0 }
 0x193   :  { %v726_v5 = vmul.f32 %v1937_v31, %v618_v15  ;;  %v727_v28 = vmul.f32 %v1938_v32, %v619_v59  ;;  %v728_v23 = vmul.f32 %v1939_v58, %v620_v39  ;;  %v784_v34 = vadd.f32 %v783_v60, %v782_v0  ;;  %v889_v15 = vld [vmem:[%s1885_s6 + $0x18] sm:$0xff]  ;;  %v888_v31 = vld [vmem:[%s1885_s6 + $0x10] sm:$0xff] }
 0x194   :  { %v775_v50 = vadd.f32 %v774_v11, %v773_v20  ;;  %v740_v4 = vmul.f32 %v1940_v40, %v688_v45  ;;  %v743_v14 = vmul.f32 %v1941_v19, %v1772_v63  ;;  %v804_v52 = vadd.f32 %v803_v17, %v802_v55  ;;  %v893_v63 = vld [vmem:[%s1885_s6 + $0x38] sm:$0xff] }
 0x195   :  { %v758_v25 = vsel %vm277_vm1, %v726_v5, 0.0  ;;  %v759_v22 = vsel %vm277_vm1, %v727_v28, 0.0  ;;  %v761_v26 = vsel %vm277_vm1, %v728_v23, 0.0  ;;  %v755_v18 = vadd.f32 %v754_v61, %v1769_v27  ;;  %910 = vmatpush.msrb.mxu2 %v893_v63  ;;  %v1944_v40 = vld [vmem:[#allocation15_spill] sm:$0xff] }
 0x196   :  { %v760_v57 = vadd.f32 %v759_v22, %v758_v25  ;;  %v815_v16 = vadd.f32 %v814_v41, %v813_v24  ;;  %v796_v12 = vrot.slane %v795_v54, 4  ;;  %v785_v47 = vrot.slane %v784_v34, 4  ;;  %v1943_v25 = vld [vmem:[#allocation16_spill] sm:$0xff] }
 0x197   :  { %v776_v21 = vrot.slane %v775_v50, 2  ;;  %v805_v51 = vsel %vm277_vm1, %v740_v4, 0.0  ;;  %v816_v27 = vsel %vm277_vm1, %v743_v14, 0.0  ;;  %v756_v10 = vrot.slane %v755_v18, 1  ;;  %911 = vmatpush.msrb.mxu2 %v892_v62 }
 0x198   :  { %v762_v53 = vadd.f32 %v761_v26, %v760_v57  ;;  %v1096_v56 = vpop.eup %1095  ;;  %v806_v61 = vadd.f32 %v805_v51, %v804_v52  ;;  %v817_v38 = vadd.f32 %v816_v27, %v815_v16  ;;  %v786_v30 = vadd.f32 %v785_v47, %v784_v34  ;;  %v1942_v34 = vld [vmem:[#allocation14_spill] sm:$0xff] }
 0x199   :  { %v707_v20 = vmul.f32 %v1096_v56, %v1809_v33  ;;  %v777_v8 = vadd.f32 %v776_v21, %v775_v50  ;;  %v717_v29 = vand.u32 2147483648, %v1809_v33  ;;  %v797_v2 = vadd.f32 %v796_v12, %v795_v54  ;;  %912 = vmatpush.msrb.mxu2 %v891_v1  ;;  %v887_v54 = vld [vmem:[%s1885_s6 + $0x8] sm:$0xff] }
 0x19a   :  { %v763_v43 = vrot.slane %v762_v53, 4  ;;  %vm712_vm0 = vweird.f32 %v1096_v56  ;;  %v715_v35 = vand.u32 2147483647, %v1809_v33  ;;  %v807_v36 = vrot.slane %v806_v61, 4 }
 0x19b   :  { %v708_v49 = vsub.f32 1.0, %v707_v20  ;;  %v757_v0 = vadd.f32 %v756_v10, %v755_v18  ;;  %vm711_vm2 = vweird.f32 %v1809_v33  ;;  %v787_v59 = vrot.slane %v786_v30, 2  ;;  %913 = vmatpush.msrb.mxu2 %v890_v7 }
 0x19c   :  { %v764_v48 = vadd.f32 %v763_v43, %v762_v53  ;;  %vm713_vm3 = vmor %vm711_vm2, %vm712_vm0  ;;  %v718_v39 = vor.u32 1.1754944e-38, %v717_v29  ;;  %v778_v24 = vrot.slane %v777_v8, 1  ;;  %v818_v41 = vrot.slane %v817_v38, 4 }
 0x19d   :  { %v709_v44 = vmul.f32 %v1096_v56, %v708_v49  ;;  %vm716_vm4 = vcmp.eq.f32.partialorder %v715_v35, 8.507059e+37  ;;  %v798_v45 = vrot.slane %v797_v2, 2  ;;  %v808_v33 = vadd.f32 %v807_v36, %v806_v61  ;;  %914 = vmatpush.msrb.mxu2 %v889_v15 }
 0x19e   :  { %v765_v37 = vrot.slane %v764_v48, 2  ;;  %vm849_vm5 = vcmask 1041409   ;;  %vm851_vm6 = vcmask 1042434   ;;  %v788_v55 = vadd.f32 %v787_v59, %v786_v30 }
 0x19f   :  { %v710_v42 = vadd.f32 %v1096_v56, %v709_v44  ;;  %v779_v17 = vadd.f32 %v778_v24, %v777_v8  ;;  %v819_v60 = vadd.f32 %v818_v41, %v817_v38  ;;  %915 = vmatpush.msrb.mxu2 %v888_v31  ;;  %vm853_vm7 = vcmask 1043459   ;;  %v983_v44 = vld [vmem:[%s1884_s5] ss:$0 sm:$0xff] }
 0x1a0   :  { %v766_v11 = vadd.f32 %v765_v37, %v764_v48  ;;  %v789_v52 = vrot.slane %v788_v55, 1  ;;  %vm855_vm8 = vcmask 1044484   ;;  %vm857_vm9 = vcmask 1045509   ;;  %v886_v37 = vld [vmem:[%s1885_s6] sm:$0xff]  ;;  %s930_s6 = sshll.u32 %s1887_s8, 4  ;;  %s931_s6 = int_to_ptr.hbm [resolvable:$true] %s930_s6 }
 0x1a1   :  { %v714_v6 = vsel %vm713_vm3, %v1096_v56, %v710_v42  ;;  %916 = vmatpush.msrb.mxu2 %v887_v54  ;;  %v820_v16 = vrot.slane %v819_v60, 2  ;;  %vm859_vm10 = vcmask 1046534   ;;  %vm861_vm11 = vcmask 1047559  }
 0x1a2   :  { %v767_v3 = vrot.slane %v766_v11, 1  ;;  %v719_v5 = vsel %vm716_vm4, %v718_v39, %v714_v6  ;;  %v790_v47 = vadd.f32 %v789_v52, %v788_v55  ;;  %vm898_vm12 = vcmask 523264  }
 0x1a3   :  { %v720_v28 = vmul.f32 %v1732_v13, %v719_v5  ;;  %v721_v58 = vmul.f32 %v1739_v46, %v719_v5  ;;  %v722_v23 = vmul.f32 %v1757_v9, %v719_v5  ;;  %v809_v13 = vrot.slane %v808_v33, 2  ;;  %917 = vmatpush.msrb.mxu2 %v886_v37 }
 0x1a4   :  { %v768_v32 = vadd.f32 %v767_v3, %v766_v11  ;;  %v799_v9 = vadd.f32 %v798_v45, %v797_v2  ;;  %v821_v51 = vadd.f32 %v820_v16, %v819_v60 }
 0x1a5   :  { %v744_v50 = vmul.f32 %v1942_v34, %v720_v28  ;;  %v745_v22 = vmul.f32 %v1943_v25, %v721_v58  ;;  %v746_v4 = vmul.f32 %v1944_v40, %v722_v23  ;;  %v810_v53 = vadd.f32 %v809_v13, %v808_v33 }
 0x1a6   :  { %v850_v57 = vsel %vm849_vm5, %v768_v32, %v757_v0  ;;  %v800_v12 = vrot.slane %v799_v9, 1  ;;  %v822_v61 = vrot.slane %v821_v51, 1  ;;  %v984_v0 = vld [vmem:[%s1886_s7] ss:$0 sm:$0xff] }
 0x1a7   :  { %v852_v46 = vsel %vm851_vm6, %v779_v17, %v850_v57  ;;  %v824_v19 = vsel %vm277_vm1, %v744_v50, 0.0  ;;  %v825_v14 = vsel %vm277_vm1, %v745_v22, 0.0  ;;  %v827_v18 = vsel %vm277_vm1, %v746_v4, 0.0 }
 0x1a8   :  { %v826_v26 = vadd.f32 %v825_v14, %v824_v19  ;;  %v811_v43 = vrot.slane %v810_v53, 1  ;;  %v854_v63 = vsel %vm853_vm7, %v790_v47, %v852_v46  ;;  %v801_v62 = vadd.f32 %v800_v12, %v799_v9 }
 0x1a9   :  { %v823_v30 = vadd.f32 %v822_v61, %v821_v51 }
 0x1aa   :  { %v828_v56 = vadd.f32 %v827_v18, %v826_v26  ;;  %v856_v10 = vsel %vm855_vm8, %v801_v62, %v854_v63  ;;  %v812_v38 = vadd.f32 %v811_v43, %v810_v53 }
 0x1ac   :  { %v829_v21 = vrot.slane %v828_v56, 4  ;;  %v858_v1 = vsel %vm857_vm9, %v812_v38, %v856_v10 }
 0x1ad   :  { %v860_v29 = vsel %vm859_vm10, %v823_v30, %v858_v1 }
 0x1ae   :  { %v830_v20 = vadd.f32 %v829_v21, %v828_v56 }
 0x1b0   :  { %v831_v27 = vrot.slane %v830_v20, 2 }
 0x1b2   :  { %v832_v48 = vadd.f32 %v831_v27, %v830_v20 }
 0x1b4   :  { %v833_v49 = vrot.slane %v832_v48, 1 }
 0x1b6   :  { %v834_v8 = vadd.f32 %v833_v49, %v832_v48 }
 0x1b8   :  { %v862_v2 = vsel %vm861_vm11, %v834_v8, %v860_v29 }
 0x1b9   :  { %963 = vmatmul.msk.f32.vlgmr.msrb.gmra.mxu1 %vm277_vm1, %v862_v2 }
 0x236   :  { %v882_v35 = vpop.f32.mrf.mxu1 }
 0x237   :  { %v883_v7 = vadd.f32 %v983_v44, %v882_v35 }
 0x239   :  { %v885_v36 = vmax.f32 %v883_v7, 0.0 }
 0x23b   :  { %964 = vmatmul.msk.f32.vlgmr.msrb.gmra.mxu2 %vm898_vm12, %v885_v36 }
 0x2be   :  { %v919_v11 = vpop.f32.mrf.mxu2 }
 0x2bf   :  { %v920_v42 = vadd.f32 %v984_v0, %v919_v11 }
 0x2c1   :  { %922 = vst [vmem:[#allocation2] sm:$0xff] %v920_v42 }
 0x2c2   :  { %933 = dma.vmem_to_hbm [thread:$0]  %s929_s19, 128, %s931_s6, [#allocation3]  }
 0x2c3   :  { %1121 = dma.done.wait [#allocation3], 128  }
 0x2c4   :  { %1122 = vsyncadd [#allocation3], 4294967168 }
 0x2c5   :  { %938 = vsyncpa [#allocation3], 1 }

</bundles_post_ra>
